<compile_context>
chip_gen: v7x
topology: tpu7x:2x2x1
jax: 0.10.0
libtpu: 0.0.40
codegen_flags: <defaults>
</compile_context>

<pallas_src>
import jax
import jax.numpy as jnp
from jax import lax
from jax.experimental import pallas as pl
from jax.experimental.pallas import tpu as pltpu

EPS = 1e-5  # PyTorch GroupNorm default


# --------------------------- VMEM limit (per-gen) --------------------------- #
def _vmem_limit_bytes():
    """~70% of physical per-core VMEM (leaves compiler scratch headroom on v7x,
    raises the default scoped cap on v5e/v6e).  Safe fallback if query fails."""
    try:
        info = pltpu.get_tpu_info()
        cap = int(getattr(info, "vmem_capacity_bytes", 0) or 0)
    except Exception:
        cap = 0
    if cap <= 0:
        return 32 * 1024 * 1024
    return int(0.70 * cap)


# ----------------------------- Pass 1 kernel -------------------------------- #
def _stats_kernel(x_ref, w_ref, sum_ref, sq_ref):
    # x_ref: (1, TS, C_in)   w_ref: (C_in, Kp)
    # sum_ref / sq_ref: (1, 1, 1, Kp) f32 — resident per-(sample, chunk) accumulators.
    @pl.when(pl.program_id(2) == 0)
    def _():
        sum_ref[...] = jnp.zeros_like(sum_ref)
        sq_ref[...] = jnp.zeros_like(sq_ref)

    # ConvTranspose3d hot path (stride == kernel): one MXU matmul per tile.
    # Bias is folded in analytically in the epilogue, so stats are on x@W only
    # (zero-padded rows / columns therefore contribute exactly zero).
    y = jnp.dot(x_ref[0], w_ref[...], preferred_element_type=jnp.float32)  # (TS, Kp)

    # Lane-resident per-column partial sums: f32 accumulation distributed over
    # the 128-lane axis, no cross-lane XLU reduce, no iota/where per step.
    sum_ref[0, 0] = sum_ref[0, 0] + jnp.sum(y, axis=0, keepdims=True)
    sq_ref[0, 0] = sq_ref[0, 0] + jnp.sum(y * y, axis=0, keepdims=True)


# ----------------------------- Pass 2 kernel -------------------------------- #
def _matmul_norm_kernel(x_ref, w_ref, sc_ref, sh_ref, o_ref):
    # Recompute x@W (cheap: C_in << Kp; avoids any f32 intermediate in HBM) and
    # apply the fused GroupNorm affine in one FMA:
    #   out = (x@W) * scale + shift,   shift already folds bias, beta and mean.
    y = jnp.dot(x_ref[0], w_ref[...], preferred_element_type=jnp.float32)  # (TS, Kp)
    o_ref[0] = (y * sc_ref[0] + sh_ref[0]).astype(o_ref.dtype)


# ------------------------------ Tile picking -------------------------------- #
def _pick_tile_rows(S, c_in, kp, in_bytes, out_bytes, vmem_limit, cap=1024):
    """Largest tile-row count (dtype-aware sublane granularity) under a
    conservative VMEM budget that also accounts for the resident weight."""
    row_step = {1: 32, 2: 16}.get(in_bytes, 8)          # f32:8, bf16:16, 8-bit:32
    budget = max(vmem_limit // 3, 4 << 20)
    fixed = 2 * c_in * kp * in_bytes + 8 * kp * 4       # dbl-buffered W + small rows
    per_row = (2 * c_in * in_bytes                      # dbl-buffered x tile
               + kp * 4                                 # f32 matmul temporary
               + 2 * kp * out_bytes)                    # dbl-buffered output tile
    avail = max(budget - fixed, per_row * row_step)
    ts = (avail // per_row) // row_step * row_step
    ts = int(max(row_step, min(cap, ts)))
    s_ceil = -(-S // row_step) * row_step
    return min(ts, s_ceil)


# -------------------------------- Wrapper ------------------------------------ #
def transposed_conv_layer(x_ncdhw, weight, bias, gamma, beta, r,
                          *, matmul_dtype=jnp.bfloat16, tile_rows=None):
    """x_ncdhw: (N, C_in, D, H, W); weight: (C_in, C_out, r, r, r);
    bias/gamma/beta: (C_out,).  Returns (N, C_out, D*r, H*r, W*r).
    matmul_dtype: dtype of the MXU inputs (default bfloat16, MXU-native on all
    TPU generations); pass jnp.float32 or None (= input dtype) for exact math.
    GroupNorm statistics / rsqrt / normalization always stay in float32."""
    N, C_in, D, H, W = x_ncdhw.shape
    C_out = weight.shape[1]
    S = D * H * W
    K = C_out * r ** 3
    Kp = max(-(-K // 128) * 128, 128)        # lane-dense output columns

    in_dtype = x_ncdhw.dtype
    mm_dtype = in_dtype if matmul_dtype is None else matmul_dtype
    in_bytes = jnp.dtype(mm_dtype).itemsize
    out_bytes = jnp.dtype(in_dtype).itemsize

    vmem_limit = _vmem_limit_bytes()
    TS = tile_rows if tile_rows is not None else _pick_tile_rows(
        S, C_in, Kp, in_bytes, out_bytes, vmem_limit)

    # Pad the token axis to a whole number of tiles (padded rows are zero and
    # contribute nothing to the bias-free stats); when there are >= 2 tiles,
    # pad to an even count so Pass 1 can split into 2 parallel chunks (v7x has
    # 2 TensorCores — keeps both busy even when N == 1).
    nS = -(-S // TS)
    if nS >= 2:
        nS += nS % 2
        n_chunks = 2
    else:
        n_chunks = 1
    Sp = nS * TS
    nS_chunk = nS // n_chunks

    # ---- plain-JAX glue: relayout to channels-last tokens (N, Sp, C_in) ----
    x_tok = jnp.transpose(x_ncdhw, (0, 2, 3, 4, 1)).reshape(N, S, C_in)
    if Sp != S:
        x_tok = jnp.pad(x_tok, ((0, 0), (0, Sp - S), (0, 0)))
    x_tok = x_tok.astype(mm_dtype)

    w_mat = weight.reshape(C_in, K).astype(jnp.float32)
    b_rep = jnp.repeat(bias.astype(jnp.float32), r ** 3)      # (K,)
    g_rep = jnp.repeat(gamma.astype(jnp.float32), r ** 3)     # (K,)
    bt_rep = jnp.repeat(beta.astype(jnp.float32), r ** 3)     # (K,)
    if Kp != K:
        w_mat = jnp.pad(w_mat, ((0, 0), (0, Kp - K)))
        b_rep = jnp.pad(b_rep, (0, Kp - K))
        g_rep = jnp.pad(g_rep, (0, Kp - K))
        bt_rep = jnp.pad(bt_rep, (0, Kp - K))
    w_mat = w_mat.astype(mm_dtype)

    # ----------------- Pass 1: statistics only (no y written) ----------------- #
    sums, sqs = pl.pallas_call(
        _stats_kernel,
        out_shape=(
            jax.ShapeDtypeStruct((N, n_chunks, 1, Kp), jnp.float32),  # sum(xW)
            jax.ShapeDtypeStruct((N, n_chunks, 1, Kp), jnp.float32),  # sum((xW)^2)
        ),
        grid_spec=pltpu.PrefetchScalarGridSpec(
            num_scalar_prefetch=0,
            grid=(N, n_chunks, nS_chunk),
            in_specs=[
                pl.BlockSpec((1, TS, C_in),
                             lambda n, c, s: (n, c * nS_chunk + s, 0)),
                pl.BlockSpec((C_in, Kp), lambda n, c, s: (0, 0)),
            ],
            out_specs=[
                pl.BlockSpec((1, 1, 1, Kp), lambda n, c, s: (n, c, 0, 0)),
                pl.BlockSpec((1, 1, 1, Kp), lambda n, c, s: (n, c, 0, 0)),
            ],
        ),
        compiler_params=pltpu.CompilerParams(
            dimension_semantics=("parallel", "parallel", "arbitrary"),
            vmem_limit_bytes=vmem_limit,
        ),
        cost_estimate=pl.CostEstimate(
            flops=2 * N * Sp * C_in * Kp + 3 * N * Sp * Kp,
            transcendentals=0,
            bytes_accessed=(N * Sp * C_in * in_bytes + C_in * Kp * in_bytes
                            + 2 * N * n_chunks * Kp * 4),
        ),
    )(x_tok, w_mat)

    # ---- tiny plain-JAX epilogue: merge partials, fold bias, build affine ----
    col_sum = jnp.sum(sums, axis=(1, 2))                      # (N, Kp): sum_s (xW)
    col_sq = jnp.sum(sqs, axis=(1, 2))                        # (N, Kp): sum_s (xW)^2
    Sf = jnp.float32(S)                                       # real token count
    # y = xW + b  =>  fold the bias analytically (padded columns have b = 0):
    ssum = jnp.sum(col_sum + Sf * b_rep[None, :], axis=-1)    # (N,)
    ssq = jnp.sum(col_sq + 2.0 * b_rep[None, :] * col_sum
                  + Sf * b_rep[None, :] ** 2, axis=-1)        # (N,)
    count = jnp.float32(S * K)                                # real element count
    mean = ssum / count
    var = jnp.maximum(ssq / count - mean * mean, 0.0)
    inv = lax.rsqrt(var + EPS)                                # (N,)
    scale = inv[:, None] * g_rep[None, :]                     # (N, Kp)
    shift = bt_rep[None, :] + (b_rep[None, :] - mean[:, None]) * scale
    scale = scale.reshape(N, 1, Kp)
    shift = shift.reshape(N, 1, Kp)

    # ------------- Pass 2: recompute matmul + fused scale/shift -------------- #
    out_tok = pl.pallas_call(
        _matmul_norm_kernel,
        out_shape=jax.ShapeDtypeStruct((N, Sp, Kp), in_dtype),
        grid_spec=pltpu.PrefetchScalarGridSpec(
            num_scalar_prefetch=0,
            grid=(N, nS),
            in_specs=[
                pl.BlockSpec((1, TS, C_in), lambda n, s: (n, s, 0)),
                pl.BlockSpec((C_in, Kp), lambda n, s: (0, 0)),
                pl.BlockSpec((1, 1, Kp), lambda n, s: (n, 0, 0)),
                pl.BlockSpec((1, 1, Kp), lambda n, s: (n, 0, 0)),
            ],
            out_specs=pl.BlockSpec((1, TS, Kp), lambda n, s: (n, s, 0)),
        ),
        compiler_params=pltpu.CompilerParams(
            dimension_semantics=("parallel", "parallel"),
            vmem_limit_bytes=vmem_limit,
        ),
        cost_estimate=pl.CostEstimate(
            flops=2 * N * Sp * C_in * Kp + 2 * N * Sp * Kp,
            transcendentals=0,
            bytes_accessed=(N * Sp * C_in * in_bytes + C_in * Kp * in_bytes
                            + 2 * N * Kp * 4 + N * Sp * Kp * out_bytes),
        ),
    )(x_tok, w_mat, scale, shift)

    # ---- plain-JAX glue: drop padding, relayout to NCDHW output ----
    out_tok = out_tok[:, :S, :K]
    y = out_tok.reshape(N, D, H, W, C_out, r, r, r)
    y = jnp.transpose(y, (0, 4, 1, 5, 2, 6, 3, 7))
    return y.reshape(N, C_out, D * r, H * r, W * r)


# ------------------------------- Reference ----------------------------------- #
def _reference(x_ncdhw, weight, bias, gamma, beta, r):
    """Independent pure-JAX reference (einsum ConvTranspose3d + GroupNorm)."""
    N, C_in, D, H, W = x_ncdhw.shape
    C_out = weight.shape[1]
    y = jnp.einsum("ncdhw,coijk->nodihjwk", x_ncdhw, weight)
    y = y.reshape(N, C_out, D * r, H * r, W * r) + bias[None, :, None, None, None]
    mean = jnp.mean(y, axis=(1, 2, 3, 4), keepdims=True)
    var = jnp.mean((y - mean) ** 2, axis=(1, 2, 3, 4), keepdims=True)
    yhat = (y - mean) / jnp.sqrt(var + EPS)
    return yhat * gamma[None, :, None, None, None] + beta[None, :, None, None, None]


if __name__ == "__main__":
    key = jax.random.PRNGKey(0)
    k_x, k_w, k_b, k_g, k_bt = jax.random.split(key, 5)

    N, dim_in, dim_out, r = 2, 8, 4, 2
    D = H = W = 4

    x = jax.random.normal(k_x, (N, dim_in, D, H, W), dtype=jnp.float32)
    weight = 0.1 * jax.random.normal(k_w, (dim_in, dim_out, r, r, r), dtype=jnp.float32)
    bias = 0.1 * jax.random.normal(k_b, (dim_out,), dtype=jnp.float32)
    gamma = 1.0 + 0.1 * jax.random.normal(k_g, (dim_out,), dtype=jnp.float32)
    beta = 0.1 * jax.random.normal(k_bt, (dim_out,), dtype=jnp.float32)

    ref = _reference(x, weight, bias, gamma, beta, r)

    # Exact-ish f32 matmul path: tight tolerance.
    out_f32 = jax.block_until_ready(
        transposed_conv_layer(x, weight, bias, gamma, beta, r,
                              matmul_dtype=jnp.float32))
    assert out_f32.shape == (N, dim_out, D * r, H * r, W * r), out_f32.shape
    if not jnp.allclose(out_f32, ref, atol=1e-4, rtol=1e-4):
        raise AssertionError("f32 Pallas kernel does not match reference")

    # Default path: bf16 MXU inputs (stats / rsqrt / normalize stay in f32).
    out_bf16 = jax.block_until_ready(
        transposed_conv_layer(x, weight, bias, gamma, beta, r))
    if not jnp.allclose(out_bf16, ref, atol=5e-2, rtol=5e-2):
        raise AssertionError("bf16 Pallas kernel drifted from reference")

    print("KERNEL_OK")
</pallas_src>

<mosaic_0001>
module attributes {stable_mosaic.version = 11 : i64} {
  func.func @_stats_kernel(%arg0: i32, %arg1: i32, %arg2: i32, %arg3: memref<1x64x8xf32, #tpu.memory_space<vmem>>, %arg4: memref<8x128xf32, #tpu.memory_space<vmem>>, %arg5: memref<1x1x1x128xf32, #tpu.memory_space<vmem>>, %arg6: memref<1x1x1x128xf32, #tpu.memory_space<vmem>>) attributes {dimension_semantics = [#tpu.dimension_semantics<parallel>, #tpu.dimension_semantics<parallel>, #tpu.dimension_semantics<arbitrary>], iteration_bounds = array<i64: 2, 1, 1>, scalar_prefetch = 0 : i64, scratch_operands = 0 : i64, tpu.core_type = #tpu.core_type<tc>, window_params = [{transform_indices = @transform_0, window_bounds = array<i64: 1, 64, 8>}, {pipeline_mode = #tpu.pipeline_mode<synchronous>, transform_indices = @transform_1, window_bounds = array<i64: 8, 128>}, {transform_indices = @transform_2, window_bounds = array<i64: 1, 1, 1, 128>}, {transform_indices = @transform_3, window_bounds = array<i64: 1, 1, 1, 128>}]} {
    %c0_i32 = arith.constant 0 : i32
    %0 = arith.cmpi eq, %arg2, %c0_i32 : i32
    %1 = arith.extui %0 : i1 to i32
    %c0_i32_0 = arith.constant 0 : i32
    %2 = arith.cmpi ne, %1, %c0_i32_0 : i32
    scf.if %2 {
      %cst_23 = arith.constant 0.000000e+00 : f32
      %24 = vector.broadcast %cst_23 : f32 to vector<1x1x1x128xf32>
      %c0_24 = arith.constant 0 : index
      %c0_25 = arith.constant 0 : index
      %c0_26 = arith.constant 0 : index
      %c0_27 = arith.constant 0 : index
      %25 = vector.load %arg5[%c0_24, %c0_25, %c0_26, %c0_27] : memref<1x1x1x128xf32, #tpu.memory_space<vmem>>, vector<1x1x1x128xf32>
      tpu.vector_store %arg5[%c0_24, %c0_25, %c0_26, %c0_27], %24 {strides = array<i32>} : memref<1x1x1x128xf32, #tpu.memory_space<vmem>>, vector<1x1x1x128xf32>,
      %cst_28 = arith.constant 0.000000e+00 : f32
      %26 = vector.broadcast %cst_28 : f32 to vector<1x1x1x128xf32>
      %c0_29 = arith.constant 0 : index
      %c0_30 = arith.constant 0 : index
      %c0_31 = arith.constant 0 : index
      %c0_32 = arith.constant 0 : index
      %27 = vector.load %arg6[%c0_29, %c0_30, %c0_31, %c0_32] : memref<1x1x1x128xf32, #tpu.memory_space<vmem>>, vector<1x1x1x128xf32>
      tpu.vector_store %arg6[%c0_29, %c0_30, %c0_31, %c0_32], %26 {strides = array<i32>} : memref<1x1x1x128xf32, #tpu.memory_space<vmem>>, vector<1x1x1x128xf32>,
    } else {
    }
    %c0 = arith.constant 0 : index
    %c0_1 = arith.constant 0 : index
    %c0_2 = arith.constant 0 : index
    %3 = vector.load %arg3[%c0, %c0_1, %c0_2] : memref<1x64x8xf32, #tpu.memory_space<vmem>>, vector<1x64x8xf32>
    %4 = vector.shape_cast %3 : vector<1x64x8xf32> to vector<64x8xf32>
    %c0_3 = arith.constant 0 : index
    %c0_4 = arith.constant 0 : index
    %5 = vector.load %arg4[%c0_3, %c0_4] : memref<8x128xf32, #tpu.memory_space<vmem>>, vector<8x128xf32>
    %cst = arith.constant dense<0.000000e+00> : vector<64x128xf32>
    %6 = tpu.matmul %4, %5, %cst {dimension_numbers = #tpu.dot_dimension_numbers<[1], [0], [0], [1], [0, 0, 1, 1], [], []>} : vector<64x8xf32>, vector<8x128xf32>, vector<64x128xf32> -> vector<64x128xf32>
    %c0_5 = arith.constant 0 : index
    %c0_6 = arith.constant 0 : index
    %c0_7 = arith.constant 0 : index
    %c0_8 = arith.constant 0 : index
    %7 = vector.load %arg5[%c0_5, %c0_6, %c0_7, %c0_8] : memref<1x1x1x128xf32, #tpu.memory_space<vmem>>, vector<1x1x1x128xf32>
    %8 = vector.shape_cast %7 : vector<1x1x1x128xf32> to vector<1x128xf32>
    %cst_9 = arith.constant dense<0.000000e+00> : vector<128xf32>
    %9 = vector.multi_reduction <add>, %6, %cst_9 [0] : vector<64x128xf32> to vector<128xf32>
    %10 = vector.shape_cast %9 : vector<128xf32> to vector<1x128xf32>
    %11 = arith.addf %8, %10 : vector<1x128xf32>
    %c0_10 = arith.constant 0 : index
    %c0_11 = arith.constant 0 : index
    %c0_12 = arith.constant 0 : index
    %c0_13 = arith.constant 0 : index
    %12 = vector.load %arg5[%c0_10, %c0_11, %c0_12, %c0_13] : memref<1x1x1x128xf32, #tpu.memory_space<vmem>>, vector<1x1x1x128xf32>
    %13 = vector.shape_cast %12 : vector<1x1x1x128xf32> to vector<1x128xf32>
    %14 = vector.shape_cast %11 : vector<1x128xf32> to vector<1x1x1x128xf32>
    tpu.vector_store %arg5[%c0_10, %c0_11, %c0_12, %c0_13], %14 {strides = array<i32>} : memref<1x1x1x128xf32, #tpu.memory_space<vmem>>, vector<1x1x1x128xf32>,
    %c0_14 = arith.constant 0 : index
    %c0_15 = arith.constant 0 : index
    %c0_16 = arith.constant 0 : index
    %c0_17 = arith.constant 0 : index
    %15 = vector.load %arg6[%c0_14, %c0_15, %c0_16, %c0_17] : memref<1x1x1x128xf32, #tpu.memory_space<vmem>>, vector<1x1x1x128xf32>
    %16 = vector.shape_cast %15 : vector<1x1x1x128xf32> to vector<1x128xf32>
    %17 = arith.mulf %6, %6 : vector<64x128xf32>
    %cst_18 = arith.constant dense<0.000000e+00> : vector<128xf32>
    %18 = vector.multi_reduction <add>, %17, %cst_18 [0] : vector<64x128xf32> to vector<128xf32>
    %19 = vector.shape_cast %18 : vector<128xf32> to vector<1x128xf32>
    %20 = arith.addf %16, %19 : vector<1x128xf32>
    %c0_19 = arith.constant 0 : index
    %c0_20 = arith.constant 0 : index
    %c0_21 = arith.constant 0 : index
    %c0_22 = arith.constant 0 : index
    %21 = vector.load %arg6[%c0_19, %c0_20, %c0_21, %c0_22] : memref<1x1x1x128xf32, #tpu.memory_space<vmem>>, vector<1x1x1x128xf32>
    %22 = vector.shape_cast %21 : vector<1x1x1x128xf32> to vector<1x128xf32>
    %23 = vector.shape_cast %20 : vector<1x128xf32> to vector<1x1x1x128xf32>
    tpu.vector_store %arg6[%c0_19, %c0_20, %c0_21, %c0_22], %23 {strides = array<i32>} : memref<1x1x1x128xf32, #tpu.memory_space<vmem>>, vector<1x1x1x128xf32>,
    return
  }
  func.func @transform_0(%arg0: i32, %arg1: i32, %arg2: i32) -> (i32, i32, i32) {
    %c1_i32 = arith.constant 1 : i32
    %0 = arith.muli %arg1, %c1_i32 : i32
    %1 = arith.addi %0, %arg2 : i32
    %c0_i32 = arith.constant 0 : i32
    %c0_i32_0 = arith.constant 0 : i32
    return %arg0, %1, %c0_i32 : i32, i32, i32
  }
  func.func @transform_1(%arg0: i32, %arg1: i32, %arg2: i32) -> (i32, i32) {
    %c0_i32 = arith.constant 0 : i32
    %c0_i32_0 = arith.constant 0 : i32
    %c0_i32_1 = arith.constant 0 : i32
    return %c0_i32, %c0_i32_0 : i32, i32
  }
  func.func @transform_2(%arg0: i32, %arg1: i32, %arg2: i32) -> (i32, i32, i32, i32) {
    %c0_i32 = arith.constant 0 : i32
    %c0_i32_0 = arith.constant 0 : i32
    %c0_i32_1 = arith.constant 0 : i32
    return %arg0, %arg1, %c0_i32, %c0_i32_0 : i32, i32, i32, i32
  }
  func.func @transform_3(%arg0: i32, %arg1: i32, %arg2: i32) -> (i32, i32, i32, i32) {
    %c0_i32 = arith.constant 0 : i32
    %c0_i32_0 = arith.constant 0 : i32
    %c0_i32_1 = arith.constant 0 : i32
    return %arg0, %arg1, %c0_i32, %c0_i32_0 : i32, i32, i32, i32
  }
}

</mosaic_0001>

<bundles_post_ra>
// kernel: tpu_custom_call.1
= control target key start
LH: loop header
LB: loop body
LE: loop exit
PB: predicated region body
PF: predicated region fallthrough
CT: control target
= control target key end

     0   :  { %9 = vsyncpa [#allocation3], 0  ;;  %s953_s0 = inlined_call_operand.vmem [shape: f32[2,64,8], index: 0, kind: input, shape index: {}]   ;;  %s954_s1 = inlined_call_operand.vmem [shape: f32[8,128], index: 1, kind: input, shape index: {}]   ;;  %s955_s2 = inlined_call_operand.hbm [shape: f32[2,1,1,128], index: 2, kind: output, shape index: {0}]   ;;  %s956_s3 = inlined_call_operand.hbm [shape: f32[2,1,1,128], index: 3, kind: output, shape index: {1}]  }
   0x1   :  { %11 = vsyncpa [#allocation3 + $0x1], 0 }
   0x2   :  { %12 = vsyncpa [#allocation5], 0 }
   0x3   :  { %14 = vsyncpa [#allocation5 + $0x1], 0  ;;  %s784_s12 = smov 0   ;;  %s786_s13 = smov 0  }
   0x4   :  { %s788_s14 = smov 0   ;;  %s790_s15 = smov 0  }
   0x5   :  { %s792_s16 = smov 0   ;;  %s794_s17 = smov 0  }
   0x6 LB: > { %s543_s18 = sadd.s32 4294967295, %s759_s17   ;;  %s544_s19 = sadd.s32 4294967294, %s759_s17   ;;  %s759_s17 = sphi %s794_s17, %s20_s17   ;;  %s755_s16 = sphi %s792_s16, %s963_s16   ;;  %s751_s15 = sphi %s790_s15, %s962_s15   ;;  %s747_s14 = sphi %s788_s14, %s961_s14   ;;  %s743_s13 = sphi %s786_s13, %s960_s13   ;;  %s739_s12 = sphi %s784_s12, %s959_s12  }
   0x7   : > { %s39_s20 = sadd.s32 1, %s755_s16  ;;  %s99_s21 = sadd.s32 1, %s747_s14 }
   0x8   : > { %p41_p0 = scmp.ge.s32.totalorder %s39_s20, 2  ;;  %p109_p1 = scmp.ne.s32.totalorder %s747_s14, %s743_s13 }
   0x9   : > { %p110_p2 = scmp.eq.s32.totalorder %s543_s18, 1  ;;  %p115_p3 = scmp.ne.s32.totalorder %s743_s13, %s739_s12 }
   0xa   : > { %s965_s20 = smov (%p41_p0, %s39_s20), 0  ;;  %p116_p5 = scmp.eq.s32.totalorder %s544_s19, 1 }
   0xb   : > { %p824_p4 = por %p110_p2, %p109_p1  ;;  %s94_s23 = ssub.s32 %s755_s16, %s965_s20 }
   0xc   : > { %p547_p6 = scmp.ge.s32.totalorder %s759_s17, 1  ;;  %p97_p7 = scmp.eq.s32.totalorder %s94_s23, 0 }
   0xd   : > { %p831_p8 = por %p116_p5, %p115_p3  ;;  %p180_p9 = scmp.lt.s32.totalorder %s759_s17, 3 }
   0xe   : > { %s837_s25 = scalar_select %p97_p7, %s747_s14, %s99_s21  }
   0xf   : > { %p181_p10 = pnand %p547_p6, %p180_p9 }
  0x10   : > { %v238_v0 = vld [vmem:[%s954_s1] sm:$0xff] (!%p181_p10)  ;;  %p214_p11 = scmp.lt.s32.totalorder (!%p181_p10), %s751_s15, 1  ;;  %vm239_vm0 = vcmask (!%p181_p10), 64512   ;;  %s856_s6 = sand.u32 (!%p181_p10), 1, %s743_s13   ;;  %v761_v9 = vmov (!%p181_p10), 0.0  }
  0x11   : > { %184 = sbr.rel (%p181_p10) target bundleno = 310 (0x136), region = 28  ;;  %572 = vmatprep.subr.mxu0 (!%p181_p10), %v238_v0  ;;  %586 = vmatprep.subr.mxu1 (!%p181_p10), %v238_v0  ;;  %s859_s7 = scalar_lea.vmem (!%p181_p10), [#allocation2], %s856_s6 }
  0x12   : > { %573 = vmatpush3.msra.mxu0 (!%p181_p10), %v238_v0  ;;  %587 = vmatpush3.msra.mxu1 (!%p181_p10), %v238_v0  ;;  %228 = vst [vmem:[%s859_s7] sm:$0x1] (!%p181_p10), %v761_v9  ;;  %s863_s8 = scalar_lea.vmem (!%p181_p10), [#allocation4], %s856_s6  ;;  %s558_s9 = sshll.u32 (!%p181_p10), %s751_s15, 4 }
  0x13   : > { %229 = vst [vmem:[%s863_s8] sm:$0x1] (!%p181_p10), %v761_v9  ;;  %s427_s10 = sshll.u32 (!%p181_p10), %s859_s7, 4  ;;  %s441_s11 = sshll.u32 (!%p181_p10), %s863_s8, 4  ;;  %s876_s10 = int_to_ptr.vmem [resolvable:$true] %s427_s10  ;;  %s884_s11 = int_to_ptr.vmem [resolvable:$true] %s441_s11 }
  0x14   : > { %s874_s21 = scalar_lea.hbm (!%p181_p10), %s955_s2, %s558_s9  ;;  %s882_s26 = scalar_lea.hbm (!%p181_p10), %s956_s3, %s558_s9 }
  0x15   : > { %s410_s27 = scalar_lea.sflag (!%p181_p10), [#allocation3], %s856_s6 }
  0x18   : > { %s215_s28 = scalar_select %p214_p11, %s751_s15, 1 }
  0x19   : > { %v369_v49 = vld [vmem:[%s859_s7] sm:$0x1] }
  0x1a   : > { %s562_s29 = sshll.u32 %s215_s28, 6  ;;  %v385_v52 = vld [vmem:[%s863_s8] sm:$0x1]  ;;  %s649_s28 = scalar_lea.vmem %s876_s10, 16 }
  0x1b   : > { %s221_s5 = scalar_lea.vmem %s953_s0, %s562_s29  ;;  %p650_p12 = scmp.ne.s32.totalorder %s876_s10, %s649_s28 }
  0x1c   : > { %v230_v1 = vld [vmem:[%s221_s5] sm:$0xff]  ;;  %v231_v2 = vld [vmem:[%s221_s5 + $0x8] sm:$0xff]  ;;  %v232_v3 = vld [vmem:[%s221_s5 + $0x10] sm:$0xff]  ;;  %s762_s29 = smov [#allocation2]  }
  0x1d   : > { %574 = vmatprep.mubr.msk.f32.mxu0 %vm239_vm0, %v230_v1  ;;  %v234_v4 = vld [vmem:[%s221_s5 + $0x20] sm:$0xff]  ;;  %v235_v5 = vld [vmem:[%s221_s5 + $0x28] sm:$0xff]  ;;  %v236_v6 = vld [vmem:[%s221_s5 + $0x30] sm:$0xff]  ;;  %p651_p13 = pnand %p650_p12, %p824_p4  ;;  %s653_s30 = sshll.u32 %s762_s29, 4  ;;  %s654_s30 = int_to_ptr.vmem [resolvable:$false] %s653_s30 }
  0x1e   : > { %575 = vmatmul.mubr.msk.f32.vlgmr.msra.gmra.mrb[0].mxu0 %vm239_vm0, %v231_v2  ;;  %580 = vmatprep.mubr.msk.f32.mxu1 %vm239_vm0, %v234_v4  ;;  %v233_v7 = vld [vmem:[%s221_s5 + $0x18] sm:$0xff]  ;;  %s655_s4 = scalar_lea.vmem %s654_s30, 32  ;;  %p656_p1 = scmp.lt.s32.totalorder %s876_s10, %s654_s30 }
  0x1f   : > { %577 = vmatprep.mubr.msk.f32.mxu0 %vm239_vm0, %v232_v3  ;;  %581 = vmatmul.mubr.msk.f32.vlgmr.msra.gmra.mrb[0].mxu1 %vm239_vm0, %v235_v5  ;;  %v237_v8 = vld [vmem:[%s221_s5 + $0x38] sm:$0xff]  ;;  %p652_p0 = pneg %p651_p13  ;;  %p657_p2 = scmp.lt.s32.totalorder %s655_s4, %s649_s28 }
  0x20   : > { %583 = vmatprep.mubr.msk.f32.mxu1 %vm239_vm0, %v236_v6 }
  0x21   : > { %p658_p3 = por %p657_p2, %p656_p1 }
  0x22   : > { %578 = vmatmul.mubr.msk.f32.gmra.mrb[2].mxu0 %vm239_vm0, %v233_v7 }
  0x23   : > { %584 = vmatmul.mubr.msk.f32.gmra.mrb[2].mxu1 %vm239_vm0, %v237_v8  ;;  %p659_p5 = pnand %p658_p3, %p652_p0 }
  0xf1   : > { %v576_v10 = vpop.f32.mrb[0].mxu0 }
  0xf2   : > { %v387_v11 = vmul.f32 %v576_v10, %v576_v10  ;;  %v330_v12 = vpop.f32.mrb[1].mxu0  ;;  %v582_v13 = vpop.f32.mrb[0].mxu1 }
  0xf3   : > { %v370_v14 = vadd.f32 %v576_v10, %v330_v12  ;;  %v386_v15 = vmul.f32 %v330_v12, %v330_v12  ;;  %v350_v16 = vpop.f32.mrb[1].mxu1  ;;  %v391_v30 = vmul.f32 %v582_v13, %v582_v13 }
  0xf4   : > { %v390_v27 = vmul.f32 %v350_v16, %v350_v16 }
  0xf5   : > { %v394_v17 = vadd.f32 %v387_v11, %v386_v15  ;;  %v579_v18 = vpop.f32.mrb[2].mxu0 }
  0xf6   : > { %v340_v19 = vpop.f32.mrb[3].mxu0  ;;  %v585_v20 = vpop.f32.mrb[2].mxu1  ;;  %v389_v24 = vmul.f32 %v579_v18, %v579_v18 }
  0xf7   : > { %v371_v21 = vadd.f32 %v370_v14, %v340_v19  ;;  %v388_v22 = vmul.f32 %v340_v19, %v340_v19  ;;  %v360_v23 = vpop.f32.mrb[3].mxu1  ;;  %v393_v36 = vmul.f32 %v585_v20, %v585_v20 }
  0xf8   : > { %v392_v33 = vmul.f32 %v360_v23, %v360_v23 }
  0xf9   : > { %v372_v25 = vadd.f32 %v579_v18, %v371_v21  ;;  %v395_v26 = vadd.f32 %v394_v17, %v388_v22 }
  0xfb   : > { %v396_v28 = vadd.f32 %v395_v26, %v389_v24  ;;  %v373_v29 = vadd.f32 %v372_v25, %v350_v16 }
  0xfd   : > { %v397_v31 = vadd.f32 %v396_v28, %v390_v27  ;;  %v374_v32 = vadd.f32 %v582_v13, %v373_v29 }
  0xff   : > { %v375_v34 = vadd.f32 %v374_v32, %v360_v23  ;;  %v398_v35 = vadd.f32 %v397_v31, %v391_v30 }
 0x101   : > { %v376_v37 = vadd.f32 %v585_v20, %v375_v34  ;;  %v399_v38 = vadd.f32 %v398_v35, %v392_v33 }
 0x103   : > { %v377_v39 = vrot.slane %v376_v37, 4  ;;  %v400_v40 = vadd.f32 %v399_v38, %v393_v36 }
 0x105   : > { %v378_v41 = vadd.f32 %v377_v39, %v376_v37  ;;  %v401_v42 = vrot.slane %v400_v40, 4 }
 0x107   : > { %v379_v43 = vrot.slane %v378_v41, 2  ;;  %v402_v44 = vadd.f32 %v401_v42, %v400_v40 }
 0x109   : > { %v380_v45 = vadd.f32 %v379_v43, %v378_v41  ;;  %v403_v46 = vrot.slane %v402_v44, 2 }
 0x10b   : > { %v381_v47 = vrot.slane %v380_v45, 1  ;;  %v404_v48 = vadd.f32 %v403_v46, %v402_v44 }
 0x10d   : > { %v382_v50 = vadd.f32 %v381_v47, %v380_v45  ;;  %v405_v51 = vrot.slane %v404_v48, 1 }
 0x10f   : > { %v383_v53 = vadd.f32 %v382_v50, %v369_v49  ;;  %v406_v54 = vadd.f32 %v405_v51, %v404_v48 }
 0x111   : > { %384 = vst [vmem:[%s859_s7] sm:$0x1] %v383_v53  ;;  %v407_v55 = vadd.f32 %v406_v54, %v385_v52 }
 0x112   : > { %662 = shalt.err (!%p659_p5)
}
 0x113   : > { %s663_s5 = scalar_lea.hbm %s874_s21, 16  ;;  %s667_s18 = scalar_lea.hbm %s955_s2, 32 }
 0x114   : > { %p664_p6 = scmp.ne.s32.totalorder %s874_s21, %s663_s5  ;;  %p668_p10 = scmp.lt.u32.totalorder %s874_s21, %s955_s2 }
 0x115   : > { %p669_p11 = scmp.lt.u32.totalorder %s667_s18, %s663_s5  ;;  %p671_p13 = scmp.lt.u32.totalorder %s663_s5, %s874_s21 }
 0x116   : > { %p665_p7 = pnand %p664_p6, %p824_p4 }
 0x117   : > { %p670_p12 = por %p669_p11, %p668_p10 }
 0x118   : > { %p666_p9 = pneg %p665_p7 }
 0x119   : > { %p672_p0 = por %p671_p13, %p670_p12 }
 0x11b   : > { %p673_p1 = pnand %p672_p0, %p666_p9 }
 0x11d   : > { %676 = shalt.err (!%p673_p1)
}
 0x11e   : > { %588 = dma.vmem_to_hbm [thread:$0]  (%p824_p4), %s876_s10, 16, %s874_s21, %s410_s27   ;;  %408 = vst [vmem:[%s863_s8] sm:$0x1] %v407_v55 }
 0x11f   : > { %s414_s23 = scalar_lea.sflag [#allocation5], %s856_s6  ;;  %s677_s28 = scalar_lea.vmem %s884_s11, 16 }
 0x120   : > { %p678_p2 = scmp.ne.s32.totalorder %s884_s11, %s677_s28  ;;  %s763_s29 = smov [#allocation4]  }
 0x121   : > { %s681_s30 = sshll.u32 %s763_s29, 4  ;;  %s682_s30 = int_to_ptr.vmem [resolvable:$false] %s681_s30 }
 0x122   : > { %p679_p3 = pnand %p678_p2, %p824_p4  ;;  %s683_s4 = scalar_lea.vmem %s682_s30, 32 }
 0x123   : > { %p684_p6 = scmp.lt.s32.totalorder %s884_s11, %s682_s30  ;;  %p685_p7 = scmp.lt.s32.totalorder %s683_s4, %s677_s28 }
 0x124   : > { %p680_p5 = pneg %p679_p3 }
 0x125   : > { %p686_p9 = por %p685_p7, %p684_p6 }
 0x127   : > { %p687_p10 = pnand %p686_p9, %p680_p5 }
 0x129   : > { %690 = shalt.err (!%p687_p10)
}
 0x12a   : > { %s691_s6 = scalar_lea.hbm %s882_s26, 16  ;;  %s695_s21 = scalar_lea.hbm %s956_s3, 32 }
 0x12b   : > { %p692_p11 = scmp.ne.s32.totalorder %s882_s26, %s691_s6  ;;  %p696_p0 = scmp.lt.u32.totalorder %s882_s26, %s956_s3 }
 0x12c   : > { %p697_p1 = scmp.lt.u32.totalorder %s695_s21, %s691_s6  ;;  %p699_p3 = scmp.lt.u32.totalorder %s691_s6, %s882_s26 }
 0x12d   : > { %p693_p12 = pnand %p692_p11, %p824_p4 }
 0x12e   : > { %p698_p2 = por %p697_p1, %p696_p0 }
 0x12f   : > { %p694_p13 = pneg %p693_p12 }
 0x130   : > { %p700_p5 = por %p699_p3, %p698_p2 }
 0x132   : > { %p701_p6 = pnand %p700_p5, %p694_p13 }
 0x134   : > { %704 = shalt.err (!%p701_p6)
}
 0x135   : > { %589 = dma.vmem_to_hbm [thread:$0]  (%p824_p4), %s884_s11, 16, %s882_s26, %s414_s23  }
 0x136 PF: > { %p599_p7 = scmp.ge.s32.totalorder %s759_s17, 2  ;;  %s453_s7 = sand.u32 1, %s739_s12  }
 0x137   : > { %s454_s9 = scalar_lea.sflag [#allocation3], %s453_s7 }
 0x138   : > { %p593_p9 = pnand %p599_p7, %p831_p8 }
 0x13a   : > { %730 = dma.done.wait (!%p593_p9), %s454_s9, 16  }
 0x13b   : > { %732 = vsyncadd (!%p593_p9), %s454_s9, 4294967280  ;;  %s462_s18 = scalar_lea.sflag [#allocation5], %s453_s7 }
 0x13c   : > { %734 = dma.done.wait (!%p593_p9), %s462_s18, 16  }
 0x13d   : > { %736 = vsyncadd (!%p593_p9), %s462_s18, 4294967280  ;;  %s20_s17 = sadd.s32 1, %s759_s17   ;;  %s959_s12 = smov %s743_s13 }
 0x13e   : > { %p17_p10 = scmp.ge.s32.totalorder %s20_s17, 4   ;;  %s960_s13 = smov %s747_s14 }
 0x13f   : > { %s961_s14 = smov %s837_s25  ;;  %s962_s15 = smov %s755_s16 }
 0x140   : > { %s963_s16 = smov %s965_s20  ;;  %19 = sbr.rel (!%p17_p10) target bundleno = 6 (0x6), region = 84 }
 0x147   :  { %466 = vsyncpa [#allocation3], 1 }
 0x148   :  { %468 = vsyncpa [#allocation3 + $0x1], 1 }
 0x149   :  { %469 = vsyncpa [#allocation5], 1 }
 0x14a   :  { %471 = vsyncpa [#allocation5 + $0x1], 1 }

</bundles_post_ra>
